<compile_context>
chip_gen: v7x
topology: tpu7x:2x2x1
jax: 0.10.0
libtpu: 0.0.40
codegen_flags: <defaults>
</compile_context>

<pallas_src>
import functools

import jax
import jax.numpy as jnp
from jax.experimental import pallas as pl
from jax.experimental.pallas import tpu as pltpu


def _round_up(x, m):
    return ((x + m - 1) // m) * m


def mlp_kernel(x_ref,
               w1_ref, b1_ref,
               w2_ref, b2_ref,
               w3_ref, b3_ref,
               w4_ref, b4_ref,
               w5_ref, b5_ref,
               o_ref):
    """Whole-MLP forward for one [features, batch_tile] tile, everything VMEM-resident.

    Activations: [features, batch_tile] (batch on the lane axis).
    Weights:     PyTorch-native [out, in].  Biases: [out, 1] (broadcast across lanes).
    """
    h = x_ref[...]                                          # [8, bt]

    def layer(h, w_ref, b_ref, apply_relu):
        # Cast only the matmul operands (h) to the weight dtype (f32 or bf16);
        # accumulate in f32 on the MXU, keep bias-add / ReLU in f32 (v5e-safe).
        y = jnp.dot(w_ref[...], h.astype(w_ref.dtype),
                    preferred_element_type=jnp.float32) + b_ref[...]
        return jnp.maximum(y, 0.0) if apply_relu else y

    h = layer(h, w1_ref, b1_ref, True)
    h = layer(h, w2_ref, b2_ref, True)
    h = layer(h, w3_ref, b3_ref, True)
    h = layer(h, w4_ref, b4_ref, True)
    y = layer(h, w5_ref, b5_ref, False)                     # [2, bt], no ReLU

    o_ref[...] = y.astype(o_ref.dtype)                      # lane-dense store (bt % 128 == 0)


def mlp_forward(x, params, *, batch_tile=512, matmul_dtype=None):
    """x: [B, 8]; params = [(w1, b1), ..., (w5, b5)] with w: [out, in], b: [out, 1].

    Returns [B, 2], matching nn.Sequential(Linear, ReLU, ..., Linear)(x).
    """
    B, F = x.shape
    assert F == params[0][0].shape[1]
    out_dim = params[-1][0].shape[0]

    # Effective batch tile: multiple of 128 (lane width / MXU-aligned), no larger than
    # the padded batch.  Padded batch is a multiple of the tile -> clean grid.
    bt = _round_up(min(batch_tile, _round_up(B, 128)), 128)
    Bp = _round_up(B, bt)
    grid = (Bp // bt,)

    # Layout plumbing in the wrapper (cheap XLA ops): batch onto the lane axis.
    xt = jnp.transpose(x)                                   # [F, B]
    if Bp != B:
        xt = jnp.pad(xt, ((0, 0), (0, Bp - B)))             # [F, Bp]

    # Optionally cast weights (matmul operands) to bf16; biases stay f32.
    flat_params = []
    param_specs = []
    for w, b in params:
        if matmul_dtype is not None:
            w = w.astype(matmul_dtype)
        flat_params.extend([w, b])
        # Constant index maps -> params stay resident across the whole grid.
        # (Double-buffering them wastes only ~20 KB; left at the default for safety.)
        param_specs.append(pl.BlockSpec(w.shape, lambda i: (0, 0)))
        param_specs.append(pl.BlockSpec(b.shape, lambda i: (0, 0)))

    # Advisory cost estimate for the XLA scheduler.
    flops = 2 * B * sum(int(w.shape[0]) * int(w.shape[1]) for w, _ in params)
    bytes_accessed = (x.size * x.dtype.itemsize
                      + B * out_dim * jnp.dtype(x.dtype).itemsize
                      + sum(w.size * w.dtype.itemsize + b.size * b.dtype.itemsize
                            for w, b in zip(flat_params[0::2], flat_params[1::2])))
    cost = pl.CostEstimate(flops=flops, transcendentals=0,
                           bytes_accessed=int(bytes_accessed))

    yt = pl.pallas_call(
        mlp_kernel,
        out_shape=jax.ShapeDtypeStruct((out_dim, Bp), x.dtype),
        grid_spec=pltpu.PrefetchScalarGridSpec(
            num_scalar_prefetch=0,
            grid=grid,
            in_specs=[pl.BlockSpec((F, bt), lambda i: (0, i))] + param_specs,
            out_specs=pl.BlockSpec((out_dim, bt), lambda i: (0, i)),
        ),
        compiler_params=pltpu.CompilerParams(
            dimension_semantics=("parallel",)),   # >=2 grid steps -> both TCs on v7x
        cost_estimate=cost,
    )(xt, *flat_params)                                     # [out_dim, Bp]

    return jnp.transpose(yt[:, :B])                         # [B, out_dim]


def init_params(key, dims):
    """PyTorch-style Linear init: U(-1/sqrt(fan_in), 1/sqrt(fan_in)); w: [out, in], b: [out, 1]."""
    params = []
    for fan_in, fan_out in zip(dims[:-1], dims[1:]):
        key, kw, kb = jax.random.split(key, 3)
        bound = 1.0 / jnp.sqrt(fan_in)
        w = jax.random.uniform(kw, (fan_out, fan_in), jnp.float32, -bound, bound)
        b = jax.random.uniform(kb, (fan_out, 1), jnp.float32, -bound, bound)
        params.append((w, b))
    return params


def reference_forward(x, params):
    h = x
    for i, (w, b) in enumerate(params):
        h = h @ w.T + b[:, 0]
        if i < len(params) - 1:
            h = jnp.maximum(h, 0.0)
    return h


if __name__ == "__main__":
    # neurons = [32, 64, 64, 32]  -> dims: 8 -> 32 -> 64 -> 64 -> 32 -> 2
    neurons = [32, 64, 64, 32]
    dims = [8] + neurons + [2]

    key = jax.random.PRNGKey(0)
    key, kx = jax.random.split(key)
    batch = 512
    x = jax.random.normal(kx, (batch, 8), jnp.float32)

    params = init_params(key, dims)
    ref = reference_forward(x, params)

    # f32 path, 4-step parallel grid (128-row tiles) -> pipelined, dual-TC-shardable.
    out = jax.block_until_ready(mlp_forward(x, params, batch_tile=128))
    assert out.shape == (batch, 2)
    assert jnp.allclose(out, ref, atol=1e-4, rtol=1e-4), "f32 mismatch vs JAX reference"

    # Small / ragged batch exercises the pad-to-tile path.
    out_small = jax.block_until_ready(mlp_forward(x[:8], params, batch_tile=128))
    assert out_small.shape == (8, 2)
    assert jnp.allclose(out_small, ref[:8], atol=1e-4, rtol=1e-4), "small-batch mismatch"

    # bf16 matmul operands (v6e/v7x traffic saving), f32 accumulation -> looser tolerance.
    out_bf16 = jax.block_until_ready(
        mlp_forward(x, params, batch_tile=128, matmul_dtype=jnp.bfloat16))
    assert jnp.allclose(out_bf16, ref, atol=5e-2, rtol=5e-2), "bf16 mismatch vs JAX reference"

    print("KERNEL_OK")
</pallas_src>

<mosaic_0001>
module attributes {stable_mosaic.version = 11 : i64} {
  func.func @mlp_kernel(%arg0: i32, %arg1: memref<8x128xf32, #tpu.memory_space<vmem>>, %arg2: memref<32x8xf32, #tpu.memory_space<vmem>>, %arg3: memref<32x1xf32, #tpu.memory_space<vmem>>, %arg4: memref<64x32xf32, #tpu.memory_space<vmem>>, %arg5: memref<64x1xf32, #tpu.memory_space<vmem>>, %arg6: memref<64x64xf32, #tpu.memory_space<vmem>>, %arg7: memref<64x1xf32, #tpu.memory_space<vmem>>, %arg8: memref<32x64xf32, #tpu.memory_space<vmem>>, %arg9: memref<32x1xf32, #tpu.memory_space<vmem>>, %arg10: memref<2x32xf32, #tpu.memory_space<vmem>>, %arg11: memref<2x1xf32, #tpu.memory_space<vmem>>, %arg12: memref<2x128xf32, #tpu.memory_space<vmem>>) attributes {dimension_semantics = [#tpu.dimension_semantics<parallel>], iteration_bounds = array<i64: 4>, scalar_prefetch = 0 : i64, scratch_operands = 0 : i64, tpu.core_type = #tpu.core_type<tc>, window_params = [{transform_indices = @transform_0, window_bounds = array<i64: 8, 128>}, {pipeline_mode = #tpu.pipeline_mode<synchronous>, transform_indices = @transform_1, window_bounds = array<i64: 32, 8>}, {pipeline_mode = #tpu.pipeline_mode<synchronous>, transform_indices = @transform_2, window_bounds = array<i64: 32, 1>}, {pipeline_mode = #tpu.pipeline_mode<synchronous>, transform_indices = @transform_3, window_bounds = array<i64: 64, 32>}, {pipeline_mode = #tpu.pipeline_mode<synchronous>, transform_indices = @transform_4, window_bounds = array<i64: 64, 1>}, {pipeline_mode = #tpu.pipeline_mode<synchronous>, transform_indices = @transform_5, window_bounds = array<i64: 64, 64>}, {pipeline_mode = #tpu.pipeline_mode<synchronous>, transform_indices = @transform_6, window_bounds = array<i64: 64, 1>}, {pipeline_mode = #tpu.pipeline_mode<synchronous>, transform_indices = @transform_7, window_bounds = array<i64: 32, 64>}, {pipeline_mode = #tpu.pipeline_mode<synchronous>, transform_indices = @transform_8, window_bounds = array<i64: 32, 1>}, {pipeline_mode = #tpu.pipeline_mode<synchronous>, transform_indices = @transform_9, window_bounds = array<i64: 2, 32>}, {pipeline_mode = #tpu.pipeline_mode<synchronous>, transform_indices = @transform_10, window_bounds = array<i64: 2, 1>}, {transform_indices = @transform_11, window_bounds = array<i64: 2, 128>}]} {
    %c0 = arith.constant 0 : index
    %c0_0 = arith.constant 0 : index
    %0 = vector.load %arg1[%c0, %c0_0] : memref<8x128xf32, #tpu.memory_space<vmem>>, vector<8x128xf32>
    %c0_1 = arith.constant 0 : index
    %c0_2 = arith.constant 0 : index
    %1 = vector.load %arg2[%c0_1, %c0_2] : memref<32x8xf32, #tpu.memory_space<vmem>>, vector<32x8xf32>
    %cst = arith.constant dense<0.000000e+00> : vector<32x128xf32>
    %2 = tpu.matmul %1, %0, %cst {dimension_numbers = #tpu.dot_dimension_numbers<[1], [0], [0], [1], [0, 0, 1, 1], [], []>} : vector<32x8xf32>, vector<8x128xf32>, vector<32x128xf32> -> vector<32x128xf32>
    %c0_3 = arith.constant 0 : index
    %c0_4 = arith.constant 0 : index
    %3 = vector.load %arg3[%c0_3, %c0_4] : memref<32x1xf32, #tpu.memory_space<vmem>>, vector<32x1xf32>
    %4 = vector.broadcast %3 : vector<32x1xf32> to vector<32x128xf32>
    %5 = arith.addf %2, %4 : vector<32x128xf32>
    %cst_5 = arith.constant 0.000000e+00 : f32
    %6 = vector.broadcast %cst_5 : f32 to vector<32x128xf32>
    %7 = arith.maximumf %5, %6 : vector<32x128xf32>
    %c0_6 = arith.constant 0 : index
    %c0_7 = arith.constant 0 : index
    %8 = vector.load %arg4[%c0_6, %c0_7] : memref<64x32xf32, #tpu.memory_space<vmem>>, vector<64x32xf32>
    %cst_8 = arith.constant dense<0.000000e+00> : vector<64x128xf32>
    %9 = tpu.matmul %8, %7, %cst_8 {dimension_numbers = #tpu.dot_dimension_numbers<[1], [0], [0], [1], [0, 0, 1, 1], [], []>} : vector<64x32xf32>, vector<32x128xf32>, vector<64x128xf32> -> vector<64x128xf32>
    %c0_9 = arith.constant 0 : index
    %c0_10 = arith.constant 0 : index
    %10 = vector.load %arg5[%c0_9, %c0_10] : memref<64x1xf32, #tpu.memory_space<vmem>>, vector<64x1xf32>
    %11 = vector.broadcast %10 : vector<64x1xf32> to vector<64x128xf32>
    %12 = arith.addf %9, %11 : vector<64x128xf32>
    %cst_11 = arith.constant 0.000000e+00 : f32
    %13 = vector.broadcast %cst_11 : f32 to vector<64x128xf32>
    %14 = arith.maximumf %12, %13 : vector<64x128xf32>
    %c0_12 = arith.constant 0 : index
    %c0_13 = arith.constant 0 : index
    %15 = vector.load %arg6[%c0_12, %c0_13] : memref<64x64xf32, #tpu.memory_space<vmem>>, vector<64x64xf32>
    %cst_14 = arith.constant dense<0.000000e+00> : vector<64x128xf32>
    %16 = tpu.matmul %15, %14, %cst_14 {dimension_numbers = #tpu.dot_dimension_numbers<[1], [0], [0], [1], [0, 0, 1, 1], [], []>} : vector<64x64xf32>, vector<64x128xf32>, vector<64x128xf32> -> vector<64x128xf32>
    %c0_15 = arith.constant 0 : index
    %c0_16 = arith.constant 0 : index
    %17 = vector.load %arg7[%c0_15, %c0_16] : memref<64x1xf32, #tpu.memory_space<vmem>>, vector<64x1xf32>
    %18 = vector.broadcast %17 : vector<64x1xf32> to vector<64x128xf32>
    %19 = arith.addf %16, %18 : vector<64x128xf32>
    %cst_17 = arith.constant 0.000000e+00 : f32
    %20 = vector.broadcast %cst_17 : f32 to vector<64x128xf32>
    %21 = arith.maximumf %19, %20 : vector<64x128xf32>
    %c0_18 = arith.constant 0 : index
    %c0_19 = arith.constant 0 : index
    %22 = vector.load %arg8[%c0_18, %c0_19] : memref<32x64xf32, #tpu.memory_space<vmem>>, vector<32x64xf32>
    %cst_20 = arith.constant dense<0.000000e+00> : vector<32x128xf32>
    %23 = tpu.matmul %22, %21, %cst_20 {dimension_numbers = #tpu.dot_dimension_numbers<[1], [0], [0], [1], [0, 0, 1, 1], [], []>} : vector<32x64xf32>, vector<64x128xf32>, vector<32x128xf32> -> vector<32x128xf32>
    %c0_21 = arith.constant 0 : index
    %c0_22 = arith.constant 0 : index
    %24 = vector.load %arg9[%c0_21, %c0_22] : memref<32x1xf32, #tpu.memory_space<vmem>>, vector<32x1xf32>
    %25 = vector.broadcast %24 : vector<32x1xf32> to vector<32x128xf32>
    %26 = arith.addf %23, %25 : vector<32x128xf32>
    %cst_23 = arith.constant 0.000000e+00 : f32
    %27 = vector.broadcast %cst_23 : f32 to vector<32x128xf32>
    %28 = arith.maximumf %26, %27 : vector<32x128xf32>
    %c0_24 = arith.constant 0 : index
    %c0_25 = arith.constant 0 : index
    %29 = vector.load %arg10[%c0_24, %c0_25] : memref<2x32xf32, #tpu.memory_space<vmem>>, vector<2x32xf32>
    %cst_26 = arith.constant dense<0.000000e+00> : vector<2x128xf32>
    %30 = tpu.matmul %29, %28, %cst_26 {dimension_numbers = #tpu.dot_dimension_numbers<[1], [0], [0], [1], [0, 0, 1, 1], [], []>} : vector<2x32xf32>, vector<32x128xf32>, vector<2x128xf32> -> vector<2x128xf32>
    %c0_27 = arith.constant 0 : index
    %c0_28 = arith.constant 0 : index
    %31 = vector.load %arg11[%c0_27, %c0_28] : memref<2x1xf32, #tpu.memory_space<vmem>>, vector<2x1xf32>
    %32 = vector.broadcast %31 : vector<2x1xf32> to vector<2x128xf32>
    %33 = arith.addf %30, %32 : vector<2x128xf32>
    %c0_29 = arith.constant 0 : index
    %c0_30 = arith.constant 0 : index
    %34 = vector.load %arg12[%c0_29, %c0_30] : memref<2x128xf32, #tpu.memory_space<vmem>>, vector<2x128xf32>
    tpu.vector_store %arg12[%c0_29, %c0_30], %33 {strides = array<i32>} : memref<2x128xf32, #tpu.memory_space<vmem>>, vector<2x128xf32>,
    return
  }
  func.func @transform_0(%arg0: i32) -> (i32, i32) {
    %c0_i32 = arith.constant 0 : i32
    %c0_i32_0 = arith.constant 0 : i32
    return %c0_i32, %arg0 : i32, i32
  }
  func.func @transform_1(%arg0: i32) -> (i32, i32) {
    %c0_i32 = arith.constant 0 : i32
    %c0_i32_0 = arith.constant 0 : i32
    %c0_i32_1 = arith.constant 0 : i32
    return %c0_i32, %c0_i32_0 : i32, i32
  }
  func.func @transform_2(%arg0: i32) -> (i32, i32) {
    %c0_i32 = arith.constant 0 : i32
    %c0_i32_0 = arith.constant 0 : i32
    %c0_i32_1 = arith.constant 0 : i32
    return %c0_i32, %c0_i32_0 : i32, i32
  }
  func.func @transform_3(%arg0: i32) -> (i32, i32) {
    %c0_i32 = arith.constant 0 : i32
    %c0_i32_0 = arith.constant 0 : i32
    %c0_i32_1 = arith.constant 0 : i32
    return %c0_i32, %c0_i32_0 : i32, i32
  }
  func.func @transform_4(%arg0: i32) -> (i32, i32) {
    %c0_i32 = arith.constant 0 : i32
    %c0_i32_0 = arith.constant 0 : i32
    %c0_i32_1 = arith.constant 0 : i32
    return %c0_i32, %c0_i32_0 : i32, i32
  }
  func.func @transform_5(%arg0: i32) -> (i32, i32) {
    %c0_i32 = arith.constant 0 : i32
    %c0_i32_0 = arith.constant 0 : i32
    %c0_i32_1 = arith.constant 0 : i32
    return %c0_i32, %c0_i32_0 : i32, i32
  }
  func.func @transform_6(%arg0: i32) -> (i32, i32) {
    %c0_i32 = arith.constant 0 : i32
    %c0_i32_0 = arith.constant 0 : i32
    %c0_i32_1 = arith.constant 0 : i32
    return %c0_i32, %c0_i32_0 : i32, i32
  }
  func.func @transform_7(%arg0: i32) -> (i32, i32) {
    %c0_i32 = arith.constant 0 : i32
    %c0_i32_0 = arith.constant 0 : i32
    %c0_i32_1 = arith.constant 0 : i32
    return %c0_i32, %c0_i32_0 : i32, i32
  }
  func.func @transform_8(%arg0: i32) -> (i32, i32) {
    %c0_i32 = arith.constant 0 : i32
    %c0_i32_0 = arith.constant 0 : i32
    %c0_i32_1 = arith.constant 0 : i32
    return %c0_i32, %c0_i32_0 : i32, i32
  }
  func.func @transform_9(%arg0: i32) -> (i32, i32) {
    %c0_i32 = arith.constant 0 : i32
    %c0_i32_0 = arith.constant 0 : i32
    %c0_i32_1 = arith.constant 0 : i32
    return %c0_i32, %c0_i32_0 : i32, i32
  }
  func.func @transform_10(%arg0: i32) -> (i32, i32) {
    %c0_i32 = arith.constant 0 : i32
    %c0_i32_0 = arith.constant 0 : i32
    %c0_i32_1 = arith.constant 0 : i32
    return %c0_i32, %c0_i32_0 : i32, i32
  }
  func.func @transform_11(%arg0: i32) -> (i32, i32) {
    %c0_i32 = arith.constant 0 : i32
    %c0_i32_0 = arith.constant 0 : i32
    return %c0_i32, %arg0 : i32, i32
  }
}

</mosaic_0001>

<bundles_post_ra>
// kernel: tpu_custom_call.1
= control target key start
LH: loop header
LB: loop body
LE: loop exit
PB: predicated region body
PF: predicated region fallthrough
CT: control target
= control target key end

     0   :  { %16 = vsyncpa [#allocation3], 0  ;;  %s1853_s0 = inlined_call_operand.vmem [shape: f32[8,512], index: 0, kind: input, shape index: {}]   ;;  %s1854_s1 = inlined_call_operand.vmem [shape: f32[32,8], index: 1, kind: input, shape index: {}]   ;;  %s1855_s2 = inlined_call_operand.vmem [shape: f32[32,1], index: 2, kind: input, shape index: {}]   ;;  %s1856_s3 = inlined_call_operand.vmem [shape: f32[64,32], index: 3, kind: input, shape index: {}]   ;;  %s1857_s4 = inlined_call_operand.vmem [shape: f32[64,1], index: 4, kind: input, shape index: {}]   ;;  %s1858_s5 = inlined_call_operand.vmem [shape: f32[64,64], index: 5, kind: input, shape index: {}]   ;;  %s1859_s6 = inlined_call_operand.vmem [shape: f32[64,1], index: 6, kind: input, shape index: {}]   ;;  %s1860_s7 = inlined_call_operand.vmem [shape: f32[32,64], index: 7, kind: input, shape index: {}]   ;;  %s1861_s8 = inlined_call_operand.vmem [shape: f32[32,1], index: 8, kind: input, shape index: {}]   ;;  %s1862_s9 = inlined_call_operand.vmem [shape: f32[2,32], index: 9, kind: input, shape index: {}]   ;;  %s1863_s10 = inlined_call_operand.vmem [shape: f32[2,1], index: 10, kind: input, shape index: {}]   ;;  %s1864_s11 = inlined_call_operand.hbm [shape: f32[2,512], index: 11, kind: output, shape index: {}]  }
   0x1   :  { %18 = vsyncpa [#allocation3 + $0x1], 0  ;;  %s1578_s17 = smov 0   ;;  %s1580_s18 = smov 0  }
   0x2   :  { %s1582_s19 = smov 0   ;;  %s1584_s20 = smov 0  }
   0x3 LB: > { %1868 = sst [smem:[#allocation5_spill]] %s1507_s19  ;;  %s1599_s21 = sadd.s32 4294967295, %s1511_s20   ;;  %s1511_s20 = sphi %s1584_s20, %s1873_s20   ;;  %s1507_s19 = sphi %s1582_s19, %s1875_s19   ;;  %s1503_s18 = sphi %s1580_s18, %s1877_s18   ;;  %s1499_s17 = sphi %s1578_s17, %s1876_s17  }
   0x4   : > { %s1184_s22 = sadd.s32 4294967294, %s1511_s20   ;;  %s1603_s23 = sadd.s32 1, %s1511_s20  }
   0x5   : > { %1869 = sst [smem:[#allocation6_spill]] %s1603_s23  ;;  %s267_s24 = sadd.s32 1, %s1507_s19 }
   0x6   : > { %s264_s25 = ssub.s32 %s1511_s20, %s1603_s23  ;;  %p277_p0 = scmp.ne.s32.totalorder %s1507_s19, %s1503_s18 }
   0x7   : > { %p265_p1 = scmp.eq.s32.totalorder %s264_s25, 0  ;;  %p278_p2 = scmp.eq.s32.totalorder %s1599_s21, 3 }
   0x8   : > { %p283_p3 = scmp.ne.s32.totalorder %s1503_s18, %s1499_s17  ;;  %p284_p4 = scmp.eq.s32.totalorder %s1184_s22, 3 }
   0x9   : > { %s1614_s26 = scalar_select %p265_p1, %s1507_s19, %s267_s24  }
   0xa   : > { %p1616_p5 = por %p278_p2, %p277_p0  ;;  %p1620_p6 = por %p284_p4, %p283_p3 }
   0xb   : > { %1870 = sst [smem:[#allocation7_spill]] %s1614_s26  ;;  %p1187_p7 = scmp.ge.s32.totalorder %s1511_s20, 1 }
   0xc   : > { %p339_p8 = scmp.lt.s32.totalorder %s1511_s20, 5 }
   0xe   : > { %p340_p9 = pnand %p1187_p7, %p339_p8 }
   0xf   : > { %p378_p10 = scmp.lt.s32.totalorder (!%p340_p9), %s1599_s21, 3  ;;  %v383_v0 = vld [vmem:[%s1854_s1] sm:$0xff] (!%p340_p9)  ;;  %vm411_vm0 = vcmask (!%p340_p9), 64512   ;;  %v1513_v1 = vmov (!%p340_p9), 0   ;;  %v389_v3 = vld [vmem:[%s1855_s2 + $0x10] sm:$0xff] (!%p340_p9)  ;;  %v388_v4 = vld [vmem:[%s1855_s2 + $0x8] sm:$0xff] (!%p340_p9) }
  0x10   : > { %343 = sbr.rel (%p340_p9) target bundleno = 1181 (0x49d), region = 64  ;;  %1271 = vmatprep.mubr.msk.f32.mxu0 (!%p340_p9), %vm411_vm0, %v383_v0  ;;  %1447 = vset.pattern.permute.xlu0 (!%p340_p9), %v1513_v1  ;;  %v387_v2 = vld [vmem:[%s1855_s2] sm:$0xff] (!%p340_p9)  ;;  %v390_v5 = vld [vmem:[%s1855_s2 + $0x18] sm:$0xff] (!%p340_p9)  ;;  %v384_v7 = vld [vmem:[%s1854_s1 + $0x8] sm:$0xff] (!%p340_p9)  ;;  %vm569_vm1 = vcmask (!%p340_p9), 261120   ;;  %vm763_vm2 = vcmask (!%p340_p9), 523264  }
  0x11   : > { %393 = vperm.xlu0 (!%p340_p9), %1447, %v387_v2   ;;  %1448 = vset.pattern.permute.xlu1 (!%p340_p9), %v1513_v1  ;;  %v385_v8 = vld [vmem:[%s1854_s1 + $0x10] sm:$0xff] (!%p340_p9)  ;;  %v521_v9 = vld [vmem:[%s1857_s4] sm:$0xff] (!%p340_p9)  ;;  %v522_v10 = vld [vmem:[%s1857_s4 + $0x8] sm:$0xff] (!%p340_p9)  ;;  %vm1515_vm3 = vmmov (!%p340_p9), 0   ;;  %s375_s30 = sand.u32 (!%p340_p9), 1, %s1503_s18  }
  0x12   : > { %403 = vperm.xlu1 (!%p340_p9), %1448, %v389_v3   ;;  %v386_v11 = vld [vmem:[%s1854_s1 + $0x18] sm:$0xff] (!%p340_p9)  ;;  %v523_v12 = vld [vmem:[%s1857_s4 + $0x10] sm:$0xff] (!%p340_p9)  ;;  %v525_v14 = vld [vmem:[%s1857_s4 + $0x20] sm:$0xff] (!%p340_p9)  ;;  %s1188_s12 = sshll.u32 (!%p340_p9), %s375_s30, 1  ;;  %s1112_s26 = scalar_lea.sflag (!%p340_p9), [#allocation3], %s375_s30 }
  0x13   : > { %v524_v13 = vld [vmem:[%s1857_s4 + $0x18] sm:$0xff] (!%p340_p9)  ;;  %v526_v15 = vld [vmem:[%s1857_s4 + $0x28] sm:$0xff] (!%p340_p9)  ;;  %v527_v16 = vld [vmem:[%s1857_s4 + $0x30] sm:$0xff] (!%p340_p9)  ;;  %s377_s15 = scalar_lea.vmem (!%p340_p9), [#allocation2], %s1188_s12 }
  0x14   : > { %v528_v17 = vld [vmem:[%s1857_s4 + $0x38] sm:$0xff] (!%p340_p9)  ;;  %v715_v18 = vld [vmem:[%s1859_s6] sm:$0xff] (!%p340_p9)  ;;  %v716_v19 = vld [vmem:[%s1859_s6 + $0x8] sm:$0xff] (!%p340_p9)  ;;  %s1125_s16 = sshll.u32 (!%p340_p9), %s377_s15, 4  ;;  %s1813_s16 = int_to_ptr.vmem [resolvable:$true] %s1125_s16 }
  0x15   : > { %398 = vperm.xlu0 (!%p340_p9), %1447, %v388_v4   ;;  %v717_v20 = vld [vmem:[%s1859_s6 + $0x10] sm:$0xff] (!%p340_p9)  ;;  %v718_v21 = vld [vmem:[%s1859_s6 + $0x18] sm:$0xff] (!%p340_p9)  ;;  %v719_v22 = vld [vmem:[%s1859_s6 + $0x20] sm:$0xff] (!%p340_p9)  ;;  %s1449_s19 = scalar_lea.vmem (!%p340_p9), %s1813_s16, 32 }
  0x16   : > { %408 = vperm.xlu1 (!%p340_p9), %1448, %v390_v5   ;;  %v720_v23 = vld [vmem:[%s1859_s6 + $0x28] sm:$0xff] (!%p340_p9)  ;;  %v721_v24 = vld [vmem:[%s1859_s6 + $0x30] sm:$0xff] (!%p340_p9)  ;;  %v722_v25 = vld [vmem:[%s1859_s6 + $0x38] sm:$0xff] (!%p340_p9)  ;;  %p1450_p11 = scmp.ne.s32.totalorder (!%p340_p9), %s1813_s16, %s1449_s19 }
  0x17   : > { %s379_s14 = scalar_select %p378_p10, %s1599_s21, 3  ;;  %v905_v26 = vld [vmem:[%s1861_s8] sm:$0xff]  ;;  %v906_v27 = vld [vmem:[%s1861_s8 + $0x8] sm:$0xff]  ;;  %v907_v28 = vld [vmem:[%s1861_s8 + $0x10] sm:$0xff] }
  0x18   : > { %v908_v29 = vld [vmem:[%s1861_s8 + $0x18] sm:$0xff]  ;;  %v1031_v30 = vld [vmem:[%s1863_s10] sm:$0x3]  ;;  %v514_v50 = vld [vmem:[%s1856_s3 + $0x8] sm:$0xff]  ;;  %p1451_p12 = pnand %p1450_p11, %p1616_p5 }
  0x19   : > { %s1189_s25 = sshll.u32 %s379_s14, 3  ;;  %531 = vperm.xlu0 %1447, %v521_v9   ;;  %v513_v31 = vld [vmem:[%s1856_s3] sm:$0xff]  ;;  %v515_v51 = vld [vmem:[%s1856_s3 + $0x10] sm:$0xff]  ;;  %v516_v52 = vld [vmem:[%s1856_s3 + $0x18] sm:$0xff] }
  0x1a   : > { %s381_s13 = scalar_lea.vmem %s1853_s0, %s1189_s25  ;;  %536 = vperm.xlu1 %1448, %v522_v10   ;;  %1285 = vmatprep.mubr.msk.f32.mxu1 %vm569_vm1, %v513_v31  ;;  %v517_v53 = vld [vmem:[%s1856_s3 + $0x20] sm:$0xff]  ;;  %v518_v54 = vld [vmem:[%s1856_s3 + $0x28] sm:$0xff]  ;;  %v519_v55 = vld [vmem:[%s1856_s3 + $0x30] sm:$0xff]  ;;  %p1452_p13 = pneg %p1451_p12 }
  0x1b   : > { %v382_v6 = vld [vmem:[%s381_s13] sm:$0xff]  ;;  %v520_v56 = vld [vmem:[%s1856_s3 + $0x38] sm:$0xff]  ;;  %v709_v31 = vld [vmem:[%s1858_s5 + $0x10] sm:$0xff]  ;;  %s1216_s13 = sshll.u32 %s1599_s21, 5  ;;  %s1517_s21 = smov [#allocation2]  }
  0x1c   : > { %1269 = vmatprep.subr.mxu0 %v382_v6  ;;  %v707_v57 = vld [vmem:[%s1858_s5] sm:$0xff]  ;;  %s1811_s24 = scalar_lea.hbm %s1864_s11, %s1216_s13  ;;  %s1453_s23 = sshll.u32 %s1517_s21, 4  ;;  %s1454_s23 = int_to_ptr.vmem [resolvable:$false] %s1453_s23 }
  0x1d   : > { %1270 = vmatpush3.msra.mxu0 %v382_v6  ;;  %541 = vperm.xlu0 %1447, %v523_v12   ;;  %s1455_s25 = scalar_lea.vmem %s1454_s23, 64  ;;  %p1456_p0 = scmp.lt.s32.totalorder %s1813_s16, %s1454_s23 }
  0x1e   : > { %1272 = vmatmul.mubr.msk.f32.vlgmr.msra.gmra.mrb[0].mxu0 %vm411_vm0, %v384_v7  ;;  %546 = vperm.xlu1 %1448, %v524_v13   ;;  %p1457_p1 = scmp.lt.s32.totalorder %s1455_s25, %s1449_s19 }
  0x1f   : > { %1274 = vmatprep.mubr.msk.f32.mxu0 %vm411_vm0, %v385_v8 }
  0x20   : > { %p1458_p2 = por %p1457_p1, %p1456_p0 }
  0x21   : > { %551 = vperm.xlu0 %1447, %v525_v14  }
  0x22   : > { %1275 = vmatmul.mubr.msk.f32.gmra.mrb[2].mxu0 %vm411_vm0, %v386_v11  ;;  %556 = vperm.xlu1 %1448, %v526_v15   ;;  %p1459_p3 = pnand %p1458_p2, %p1452_p13 }
  0x23   : > { %1313 = vmatprep.mubr.msk.f32.mxu0 %vm763_vm2, %v707_v57 }
  0x25   : > { %561 = vperm.xlu0 %1447, %v527_v16  }
  0x26   : > { %566 = vperm.xlu1 %1448, %v528_v17  }
  0x29   : > { %725 = vperm.xlu0 %1447, %v715_v18  }
  0x2a   : > { %730 = vperm.xlu1 %1448, %v716_v19  }
  0x2d   : > { %735 = vperm.xlu0 %1447, %v717_v20  }
  0x2e   : > { %740 = vperm.xlu1 %1448, %v718_v21  }
  0x31   : > { %745 = vperm.xlu0 %1447, %v719_v22  }
  0x32   : > { %750 = vperm.xlu1 %1448, %v720_v23  }
  0x35   : > { %755 = vperm.xlu0 %1447, %v721_v24  }
  0x36   : > { %760 = vperm.xlu1 %1448, %v722_v25  }
  0x39   : > { %911 = vperm.xlu0 %1447, %v905_v26  }
  0x3a   : > { %916 = vperm.xlu1 %1448, %v906_v27  }
  0x3d   : > { %921 = vperm.xlu0 %1447, %v907_v28  }
  0x3e   : > { %926 = vperm.xlu1 %1448, %v908_v29  }
  0x41   : > { %1034 = vperm.xlu0 %1447, %v1031_v30   ;;  %v708_v30 = vld [vmem:[%s1858_s5 + $0x8] sm:$0xff] }
  0x90   : > { %v394_v32 = vpop.permute.xlu0 %393 }
  0x91   : > { %v404_v33 = vpop.permute.xlu1 %403 }
  0x94   : > { %v399_v34 = vpop.permute.xlu0 %398 }
  0x95   : > { %v409_v40 = vpop.permute.xlu1 %408 }
  0x98   : > { %v532_v59 = vpop.permute.xlu0 %531 }
  0x99   : > { %v537_v58 = vpop.permute.xlu1 %536 }
  0x9c   : > { %v542_v62 = vpop.permute.xlu0 %541 }
  0x9d   : > { %v547_v60 = vpop.permute.xlu1 %546 }
  0xa0   : > { %v552_v10 = vpop.permute.xlu0 %551 }
  0xa1   : > { %v557_v7 = vpop.permute.xlu1 %556 }
  0xa4   : > { %v562_v22 = vpop.permute.xlu0 %561 }
  0xa5   : > { %v567_v19 = vpop.permute.xlu1 %566 }
  0xf1   : > { %v1273_v35 = vpop.f32.mrb[0].mxu0 }
  0xf2   : > { %v496_v36 = vadd.f32 %v1273_v35, %v399_v34  ;;  %v490_v37 = vpop.f32.mrb[1].mxu0  ;;  %v712_v34 = vld [vmem:[%s1858_s5 + $0x28] sm:$0xff]  ;;  %v713_v35 = vld [vmem:[%s1858_s5 + $0x30] sm:$0xff] }
  0xf3   : > { %v491_v38 = vadd.f32 %v490_v37, %v394_v32  ;;  %v710_v32 = vld [vmem:[%s1858_s5 + $0x18] sm:$0xff]  ;;  %v901_v37 = vld [vmem:[%s1860_s7] sm:$0xff] }
  0xf4   : > { %v510_v39 = vmax.f32 %v496_v36, 0.0  ;;  %v714_v36 = vld [vmem:[%s1858_s5 + $0x38] sm:$0xff] }
  0xf5   : > { %v509_v41 = vmax.f32 %v491_v38, 0.0  ;;  %v1276_v42 = vpop.f32.mrb[2].mxu0  ;;  %v731_v38 = vpop.permute.xlu1 %730 }
  0xf6   : > { %v506_v43 = vadd.f32 %v1276_v42, %v409_v40  ;;  %v500_v44 = vpop.f32.mrb[3].mxu0 }
  0xf7   : > { %v501_v45 = vadd.f32 %v500_v44, %v404_v33  ;;  %v1358_v46 = vpack.c.bf16 %v510_v39, %v509_v41  ;;  %v711_v33 = vld [vmem:[%s1858_s5 + $0x20] sm:$0xff]  ;;  %v726_v39 = vpop.permute.xlu0 %725 }
  0xf8   : > { %v512_v47 = vmax.f32 %v506_v43, 0.0 }
  0xf9   : > { %v511_v48 = vmax.f32 %v501_v45, 0.0  ;;  %1359 = vmatprep.subr.bf16.mxu1 %v1358_v46  ;;  %v741_v40 = vpop.permute.xlu1 %740 }
  0xfa   : > { %1361 = vmatpush3.bf16.msra.mxu1 %v1358_v46 }
  0xfb   : > { %v1362_v49 = vpack.c.bf16 %v512_v47, %v511_v48  ;;  %v736_v42 = vpop.permute.xlu0 %735 }
  0xfd   : > { %1363 = vmatprep.subr.bf16.mxu1 %v1362_v49 }
  0xfe   : > { %1365 = vmatpush3.bf16.msra.mxu1 %v1362_v49 }
 0x101   : > { %1286 = vmatmul.mubr.msk.f32.vlgmr.msra.gmra.mrb[0].mxu1 %vm569_vm1, %v514_v50 }
 0x102   : > { %1288 = vmatprep.mubr.msk.f32.mxu1 %vm569_vm1, %v515_v51  ;;  %v751_v51 = vpop.permute.xlu1 %750 }
 0x105   : > { %1289 = vmatmul.mubr.msk.f32.gmra.mrb[2].mxu1 %vm569_vm1, %v516_v52 }
 0x106   : > { %1291 = vmatprep.mubr.msk.f32.mxu1 %vm569_vm1, %v517_v53 }
 0x109   : > { %1292 = vmatmul.mubr.msk.f32.gmra.mrb[4].mxu1 %vm569_vm1, %v518_v54  ;;  %v746_v54 = vpop.permute.xlu0 %745 }
 0x10a   : > { %1294 = vmatprep.mubr.msk.f32.mxu1 %vm569_vm1, %v519_v55 }
 0x10d   : > { %1295 = vmatmul.mubr.msk.f32.gmra.mrb[6].mxu1 %vm569_vm1, %v520_v56 }
 0x10e   : > { %1341 = vmatprep.mubr.msk.f32.mxu1 %vm763_vm2, %v901_v37 }
 0x1d4   : > { %v1287_v61 = vpop.f32.mrb[0].mxu1 }
 0x1d5   : > { %v666_v63 = vadd.f32 %v1287_v61, %v537_v58  ;;  %v660_v0 = vpop.f32.mrb[1].mxu1 }
 0x1d6   : > { %v661_v1 = vadd.f32 %v660_v0, %v532_v59 }
 0x1d7   : > { %v700_v2 = vmax.f32 %v666_v63, 0.0  ;;  %v761_v63 = vpop.permute.xlu1 %760 }
 0x1d8   : > { %v699_v3 = vmax.f32 %v661_v1, 0.0  ;;  %v1290_v4 = vpop.f32.mrb[2].mxu1 }
 0x1d9   : > { %v676_v5 = vadd.f32 %v1290_v4, %v547_v60  ;;  %v670_v6 = vpop.f32.mrb[3].mxu1 }
 0x1da   : > { %v1366_v8 = vpack.c.bf16 %v700_v2, %v699_v3  ;;  %v671_v9 = vadd.f32 %v670_v6, %v542_v62  ;;  %v756_v2 = vpop.permute.xlu0 %755 }
 0x1db   : > { %v702_v11 = vmax.f32 %v676_v5, 0.0 }
 0x1dc   : > { %v701_v12 = vmax.f32 %v671_v9, 0.0  ;;  %v1293_v13 = vpop.f32.mrb[4].mxu1  ;;  %1367 = vmatprep.subr.bf16.mxu0 %v1366_v8 }
 0x1dd   : > { %v686_v14 = vadd.f32 %v1293_v13, %v557_v7  ;;  %v680_v15 = vpop.f32.mrb[5].mxu1  ;;  %1369 = vmatpush3.bf16.msra.mxu0 %v1366_v8  ;;  %v1514_v13 = vmov 0.0|0.0  }
 0x1de   : > { %v1370_v16 = vpack.c.bf16 %v702_v11, %v701_v12  ;;  %v681_v17 = vadd.f32 %v680_v15, %v552_v10  ;;  %v902_v10 = vld [vmem:[%s1860_s7 + $0x8] sm:$0xff]  ;;  %v903_v11 = vld [vmem:[%s1860_s7 + $0x10] sm:$0xff]  ;;  %v904_v12 = vld [vmem:[%s1860_s7 + $0x18] sm:$0xff]  ;;  %v917_v15 = vpop.permute.xlu1 %916 }
 0x1df   : > { %v704_v18 = vmax.f32 %v686_v14, 0.0  ;;  %v1516_v14 = vmov 0.0  }
 0x1e0   : > { %v703_v20 = vmax.f32 %v681_v17, 0.0  ;;  %v1296_v21 = vpop.f32.mrb[6].mxu1  ;;  %1371 = vmatprep.subr.bf16.mxu0 %v1370_v16 }
 0x1e1   : > { %v696_v23 = vadd.f32 %v1296_v21, %v567_v19  ;;  %v690_v24 = vpop.f32.mrb[7].mxu1  ;;  %1373 = vmatpush3.bf16.msra.mxu0 %v1370_v16  ;;  %v912_v16 = vpop.permute.xlu0 %911 }
 0x1e2   : > { %v1374_v25 = vpack.c.bf16 %v704_v18, %v703_v20  ;;  %v691_v26 = vadd.f32 %v690_v24, %v562_v22  ;;  %v927_v22 = vpop.permute.xlu1 %926 }
 0x1e3   : > { %v706_v27 = vmax.f32 %v696_v23, 0.0 }
 0x1e4   : > { %v705_v28 = vmax.f32 %v691_v26, 0.0  ;;  %1375 = vmatprep.subr.bf16.mxu0 %v1374_v25 }
 0x1e5   : > { %1377 = vmatpush3.bf16.msra.mxu0 %v1374_v25  ;;  %v922_v25 = vpop.permute.xlu0 %921 }
 0x1e6   : > { %v1378_v29 = vpack.c.bf16 %v706_v27, %v705_v28 }
 0x1e8   : > { %1379 = vmatprep.subr.bf16.mxu0 %v1378_v29 }
 0x1e9   : > { %1381 = vmatpush3.bf16.msra.mxu0 %v1378_v29 }
 0x1ec   : > { %1314 = vmatmul.mubr.msk.f32.vlgmr.msra.gmra.mrb[4].mxu0 %vm763_vm2, %v708_v30 }
 0x1ed   : > { %1316 = vmatprep.mubr.msk.f32.mxu0 %vm763_vm2, %v709_v31 }
 0x1f0   : > { %1317 = vmatmul.mubr.msk.f32.gmra.mrb[6].mxu0 %vm763_vm2, %v710_v32 }
 0x1f1   : > { %1319 = vmatprep.mubr.msk.f32.mxu0 %vm763_vm2, %v711_v33  ;;  %v1030_v33 = vld [vmem:[%s1862_s9] sm:$0x3] }
 0x1f4   : > { %1320 = vmatmul.mubr.msk.f32.gmra.mrb[8].mxu0 %vm763_vm2, %v712_v34  ;;  %v1035_v34 = vpop.permute.xlu0 %1034 }
 0x1f5   : > { %1322 = vmatprep.mubr.msk.f32.mxu0 %vm763_vm2, %v713_v35 }
 0x1f8   : > { %1323 = vmatmul.mubr.msk.f32.gmra.mrb[10].mxu0 %vm763_vm2, %v714_v36 }
 0x2bf   : > { %v1315_v41 = vpop.f32.mrb[4].mxu0 }
 0x2c0   : > { %v860_v43 = vadd.f32 %v1315_v41, %v731_v38  ;;  %v854_v44 = vpop.f32.mrb[5].mxu0 }
 0x2c1   : > { %v855_v45 = vadd.f32 %v854_v44, %v726_v39 }
 0x2c2   : > { %v894_v46 = vmax.f32 %v860_v43, 0.0 }
 0x2c3   : > { %v893_v47 = vmax.f32 %v855_v45, 0.0  ;;  %v1318_v48 = vpop.f32.mrb[6].mxu0 }
 0x2c4   : > { %v870_v49 = vadd.f32 %v1318_v48, %v741_v40  ;;  %v864_v50 = vpop.f32.mrb[7].mxu0 }
 0x2c5   : > { %v1382_v52 = vpack.c.bf16 %v894_v46, %v893_v47  ;;  %v865_v53 = vadd.f32 %v864_v50, %v736_v42 }
 0x2c6   : > { %v896_v55 = vmax.f32 %v870_v49, 0.0 }
 0x2c7   : > { %v895_v56 = vmax.f32 %v865_v53, 0.0  ;;  %v1321_v57 = vpop.f32.mrb[8].mxu0  ;;  %1383 = vmatprep.subr.bf16.mxu1 %v1382_v52 }
 0x2c8   : > { %v880_v58 = vadd.f32 %v1321_v57, %v751_v51  ;;  %v874_v59 = vpop.f32.mrb[9].mxu0  ;;  %1385 = vmatpush3.bf16.msra.mxu1 %v1382_v52 }
 0x2c9   : > { %v1386_v60 = vpack.c.bf16 %v896_v55, %v895_v56  ;;  %v875_v61 = vadd.f32 %v874_v59, %v746_v54 }
 0x2ca   : > { %v898_v62 = vmax.f32 %v880_v58, 0.0 }
 0x2cb   : > { %v897_v0 = vmax.f32 %v875_v61, 0.0  ;;  %v1324_v1 = vpop.f32.mrb[10].mxu0  ;;  %1387 = vmatprep.subr.bf16.mxu1 %v1386_v60 }
 0x2cc   : > { %v890_v3 = vadd.f32 %v1324_v1, %v761_v63  ;;  %v884_v4 = vpop.f32.mrb[11].mxu0  ;;  %1389 = vmatpush3.bf16.msra.mxu1 %v1386_v60 }
 0x2cd   : > { %v1390_v5 = vpack.c.bf16 %v898_v62, %v897_v0  ;;  %v885_v6 = vadd.f32 %v884_v4, %v756_v2 }
 0x2ce   : > { %v900_v7 = vmax.f32 %v890_v3, 0.0 }
 0x2cf   : > { %v899_v8 = vmax.f32 %v885_v6, 0.0  ;;  %1391 = vmatprep.subr.bf16.mxu1 %v1390_v5 }
 0x2d0   : > { %1393 = vmatpush3.bf16.msra.mxu1 %v1390_v5 }
 0x2d1   : > { %v1394_v9 = vpack.c.bf16 %v900_v7, %v899_v8 }
 0x2d3   : > { %1395 = vmatprep.subr.bf16.mxu1 %v1394_v9 }
 0x2d4   : > { %1397 = vmatpush3.bf16.msra.mxu1 %v1394_v9 }
 0x2d5   : > { %1398 = vmatprep.subr.bf16.mxu1 %v1514_v13 }
 0x2d7   : > { %1342 = vmatmul.mubr.msk.f32.vlgmr.msra.gmra.mrb[8].mxu1 %vm763_vm2, %v902_v10 }
 0x2d8   : > { %1344 = vmatprep.mubr.msk.f32.mxu1 %vm763_vm2, %v903_v11 }
 0x2db   : > { %1345 = vmatmul.mubr.msk.f32.gmra.mrb[10].mxu1 %vm763_vm2, %v904_v12 }
 0x2dc   : > { %1355 = vmatprep.mubr.msk.f32.mxu1 %vm1515_vm3, %v1516_v14 }
 0x3aa   : > { %v1343_v17 = vpop.f32.mrb[8].mxu1 }
 0x3ab   : > { %v1013_v18 = vadd.f32 %v1343_v17, %v917_v15  ;;  %v1007_v19 = vpop.f32.mrb[9].mxu1 }
 0x3ac   : > { %v1008_v20 = vadd.f32 %v1007_v19, %v912_v16 }
 0x3ad   : > { %v1027_v21 = vmax.f32 %v1013_v18, 0.0 }
 0x3ae   : > { %v1026_v23 = vmax.f32 %v1008_v20, 0.0  ;;  %v1346_v24 = vpop.f32.mrb[10].mxu1 }
 0x3af   : > { %v1023_v26 = vadd.f32 %v1346_v24, %v927_v22  ;;  %v1017_v27 = vpop.f32.mrb[11].mxu1 }
 0x3b0   : > { %v1399_v28 = vpack.c.bf16 %v1027_v21, %v1026_v23  ;;  %v1018_v29 = vadd.f32 %v1017_v27, %v922_v25 }
 0x3b1   : > { %v1029_v30 = vmax.f32 %v1023_v26, 0.0 }
 0x3b2   : > { %v1028_v31 = vmax.f32 %v1018_v29, 0.0  ;;  %1400 = vmatpush3.bf16.msra.mxu1 %v1399_v28 }
 0x3b3   : > { %1401 = vmatprep.subr.bf16.mxu1 %v1514_v13 }
 0x3b4   : > { %v1402_v32 = vpack.c.bf16 %v1029_v30, %v1028_v31 }
 0x3b6   : > { %1403 = vmatpush3.bf16.msra.mxu1 %v1402_v32 }
 0x3b9   : > { %1356 = vmatmul.mubr.msk.f32.vlgmr.msra.gmra.mrb[12].mxu1 %vm569_vm1, %v1030_v33 }
 0x48c   : > { %v1106_v35 = vpop.f32.mrb[12].mxu1 }
 0x48d   : > { %v1107_v36 = vadd.f32 %v1106_v35, %v1035_v34  ;;  %v1357_v37 = vpop.f32.mrb[13].mxu1 }
 0x48f   : > { %1110 = vst [vmem:[%s377_s15] sm:$0x3] %v1107_v36 }
 0x490   : > { %1462 = shalt.err (!%p1459_p3)
}
 0x491   : > { %s1463_s29 = scalar_lea.hbm %s1811_s24, 32  ;;  %s1467_s13 = scalar_lea.hbm %s1864_s11, 128 }
 0x492   : > { %p1464_p4 = scmp.ne.s32.totalorder %s1811_s24, %s1463_s29  ;;  %p1468_p9 = scmp.lt.u32.totalorder %s1811_s24, %s1864_s11 }
 0x493   : > { %p1469_p10 = scmp.lt.u32.totalorder %s1467_s13, %s1463_s29  ;;  %p1471_p12 = scmp.lt.u32.totalorder %s1463_s29, %s1811_s24 }
 0x494   : > { %p1465_p7 = pnand %p1464_p4, %p1616_p5 }
 0x495   : > { %p1470_p11 = por %p1469_p10, %p1468_p9 }
 0x496   : > { %p1466_p8 = pneg %p1465_p7 }
 0x497   : > { %p1472_p13 = por %p1471_p12, %p1470_p11 }
 0x499   : > { %p1473_p0 = pnand %p1472_p13, %p1466_p8 }
 0x49b   : > { %1476 = shalt.err (!%p1473_p0)
}
 0x49c   : > { %1404 = dma.vmem_to_hbm [thread:$0]  (%p1616_p5), %s1813_s16, 32, %s1811_s24, %s1112_s26  }
 0x49d PF: > { %p1410_p1 = scmp.ge.s32.totalorder %s1511_s20, 2  ;;  %s1137_s22 = sand.u32 1, %s1499_s17  }
 0x49e   : > { %s1138_s19 = scalar_lea.sflag [#allocation3], %s1137_s22 }
 0x49f   : > { %p1407_p2 = pnand %p1410_p1, %p1620_p6 }
 0x4a1   : > { %1494 = dma.done.wait (!%p1407_p2), %s1138_s19, 32  }
 0x4a2   : > { %1496 = vsyncadd (!%p1407_p2), %s1138_s19, 4294967264  ;;  %s1873_s20 = sld [smem:[#allocation6_spill]]  ;;  %s1874_s21 = sld [smem:[#allocation5_spill]] }
 0x4a3   : > { %s1875_s19 = sld [smem:[#allocation7_spill]]  ;;  %s1876_s17 = smov %s1503_s18 }
 0x4a8   : > { %p21_p3 = scmp.ge.s32.totalorder %s1873_s20, 6   ;;  %s1877_s18 = smov %s1874_s21 }
 0x4aa   :  { %23 = sbr.rel (!%p21_p3) target bundleno = 3 (0x3), region = 99 }
 0x4b1   :  { %1143 = vsyncpa [#allocation3], 1 }
 0x4b2   :  { %1145 = vsyncpa [#allocation3 + $0x1], 1 }

</bundles_post_ra>
